<compile_context>
chip_gen: v7x
topology: tpu7x:2x2x1
jax: 0.10.0
libtpu: 0.0.40
codegen_flags: <defaults>
</compile_context>

<pallas_src>
import functools

import jax
import jax.numpy as jnp
from jax.experimental import pallas as pl
from jax.experimental.pallas import tpu as pltpu


def _round_up(x, m):
    return ((x + m - 1) // m) * m


# ----------------------------------------------------------------------------
# Single-shot kernel (small slabs).
# ----------------------------------------------------------------------------
def _w_loss_single_kernel(scalars_ref, w_ref, labels_ref, out_ref):
    """scalars_ref: SMEM (2,) f32 [loss, weight]; w_ref: VMEM (N, P);
    labels_ref: VMEM (1, P); out_ref: SMEM (1,) f32."""
    diff = labels_ref[...].astype(jnp.float32) - w_ref[...].astype(jnp.float32)
    total = jnp.sum(jnp.abs(diff))
    out_ref[0] = scalars_ref[0] + scalars_ref[1] * total


def _w_loss_single_shot(scalars, w_flat, labels_flat, N, P0, itemsize):
    P = _round_up(P0, 128)
    if P != P0:
        # Zero-pad BOTH labels and w -> padded lanes contribute |0-0| = 0.
        w_flat = jnp.pad(w_flat, ((0, 0), (0, P - P0)))
        labels_flat = jnp.pad(labels_flat, ((0, 0), (0, P - P0)))

    cost = pl.CostEstimate(
        flops=int(3 * N * P),
        transcendentals=0,
        bytes_accessed=int((N + 1) * P * itemsize + 12),
    )
    out = pl.pallas_call(
        _w_loss_single_kernel,
        out_shape=jax.ShapeDtypeStruct((1,), jnp.float32),
        in_specs=[
            pl.BlockSpec(memory_space=pltpu.MemorySpace.SMEM),   # [loss, weight]
            pl.BlockSpec(memory_space=pltpu.MemorySpace.VMEM),   # w_flat (full)
            pl.BlockSpec(memory_space=pltpu.MemorySpace.VMEM),   # labels (full)
        ],
        out_specs=pl.BlockSpec(memory_space=pltpu.MemorySpace.SMEM),
        cost_estimate=cost,
    )(scalars, w_flat, labels_flat)
    return out[0]


# ----------------------------------------------------------------------------
# Gridded kernel (large slabs): pipelined, VPU-only steady state.
# ----------------------------------------------------------------------------
def _w_loss_grid_kernel(scalars_ref, w_ref, labels_ref, out_ref, acc_ref, *,
                        n_valid_rows):
    """Grid = (column chunks [outer], row chunks [inner/fastest]).

    scalars_ref : SMEM (2,) f32   [loss, weight]
    w_ref       : VMEM (bN, bP)   current block of the stacked w slab
    labels_ref  : VMEM (1, bP)    labels slice for this column chunk (resident
                                  across row chunks: index_map constant in ir)
    out_ref     : SMEM (1,) f32   final scalar
    acc_ref     : VMEM (8, bP) f32 running elementwise accumulator
    """
    jc = pl.program_id(0)            # column (lane) chunk — slow axis
    ir = pl.program_id(1)            # row chunk — fast axis
    n_jc = pl.num_programs(0)
    n_ir = pl.num_programs(1)

    @pl.when((jc == 0) & (ir == 0))
    def _():
        acc_ref[...] = jnp.zeros_like(acc_ref)

    bN, bP = w_ref.shape
    diff = labels_ref[...].astype(jnp.float32) - w_ref[...].astype(jnp.float32)
    ad = jnp.abs(diff)                                   # (bN, bP), pure VPU

    # Mask garbage rows of the (possibly partial) last row chunk. Resolved at
    # trace time: no masking code is emitted when N divides evenly.
    if n_valid_rows % bN != 0:
        row_ids = ir * bN + jax.lax.broadcasted_iota(jnp.int32, (bN, bP), 0)
        ad = jnp.where(row_ids < n_valid_rows, ad, 0.0)

    # Fold the bN rows into the (8, bP) accumulator with a pairwise tree of
    # elementwise adds (VPU only; tile-aligned static slices, no relayout).
    parts = [ad[g * 8:(g + 1) * 8, :] for g in range(bN // 8)]
    while len(parts) > 1:
        nxt = [parts[a] + parts[a + 1] for a in range(0, len(parts) - 1, 2)]
        if len(parts) % 2:
            nxt.append(parts[-1])
        parts = nxt
    acc_ref[...] += parts[0]

    # Single deferred XLU reduce + scalar epilogue, once at the very end.
    @pl.when((jc == n_jc - 1) & (ir == n_ir - 1))
    def _():
        total = jnp.sum(acc_ref[...])
        out_ref[0] = scalars_ref[0] + scalars_ref[1] * total


def _w_loss_gridded(scalars, w_flat, labels_flat, N, P0, itemsize):
    # Lane-dense block sizing: keep last dim >= 512 lanes, block ~1 MB.
    P128 = _round_up(P0, 128)
    if P128 <= 4096:
        bP = P128                     # single column chunk
    else:
        bP = 512
    P_pad = _round_up(P0, bP)
    if P_pad != P0:
        w_flat = jnp.pad(w_flat, ((0, 0), (0, P_pad - P0)))
        labels_flat = jnp.pad(labels_flat, ((0, 0), (0, P_pad - P0)))

    target_block_bytes = 1 << 20      # ~1 MB blocks => well under every
                                      # generation's scoped-VMEM default
    rows_target = max(8, (target_block_bytes // (bP * itemsize)) // 8 * 8)
    bN = max(8, min(_round_up(N, 8), rows_target))    # multiple of 8

    n_col = P_pad // bP
    n_row = pl.cdiv(N, bN)
    grid = (n_col, n_row)             # row chunks innermost => labels resident

    kernel = functools.partial(_w_loss_grid_kernel, n_valid_rows=N)

    cost = pl.CostEstimate(
        flops=int(3 * N * P_pad),
        transcendentals=0,
        bytes_accessed=int(N * P_pad * itemsize + P_pad * itemsize + 12),
    )

    out = pl.pallas_call(
        kernel,
        out_shape=jax.ShapeDtypeStruct((1,), jnp.float32),
        grid=grid,
        in_specs=[
            pl.BlockSpec(memory_space=pltpu.MemorySpace.SMEM),       # scalars
            pl.BlockSpec((bN, bP), lambda jc, ir: (ir, jc)),         # w block
            pl.BlockSpec((1, bP), lambda jc, ir: (0, jc)),           # labels
        ],
        out_specs=pl.BlockSpec(memory_space=pltpu.MemorySpace.SMEM),
        scratch_shapes=[pltpu.VMEM((8, bP), jnp.float32)],
        compiler_params=pltpu.CompilerParams(
            dimension_semantics=("arbitrary", "arbitrary")),
        cost_estimate=cost,
    )(scalars, w_flat, labels_flat)
    return out[0]


# ----------------------------------------------------------------------------
# Public wrapper.
# ----------------------------------------------------------------------------
def w_loss_forward(w_all, labels_w, loss, weight=0.001, *,
                   single_shot_max_bytes=2 * 1024 * 1024):
    """Pallas equivalent of w_loss.forward.

    w_all   : list/tuple of (R, C) arrays, a pre-stacked (N, R, C)/(N, P)
              array (preferred: avoids the jnp.stack HBM round trip), or a
              single array with the same shape as labels_w.
    labels_w: (R, C) array
    loss    : scalar
    """
    labels_w = jnp.asarray(labels_w)
    if isinstance(w_all, (list, tuple)):
        if len(w_all) == 0:
            return jnp.asarray(loss, jnp.float32)
        w_stack = jnp.stack([jnp.asarray(w) for w in w_all], axis=0)
    else:
        w_stack = jnp.asarray(w_all)
        if w_stack.shape == labels_w.shape:     # single w, no stack axis
            w_stack = w_stack[None]

    N = int(w_stack.shape[0])
    P0 = int(labels_w.size)
    itemsize = int(jnp.dtype(w_stack.dtype).itemsize)

    # Row-major reshape of a contiguous array: layout no-op, no HBM copy.
    w_flat = w_stack.reshape(N, P0)
    labels_flat = labels_w.reshape(1, P0)

    scalars = jnp.stack(
        [jnp.asarray(loss, jnp.float32), jnp.asarray(weight, jnp.float32)]
    )

    slab_bytes = N * _round_up(P0, 128) * itemsize
    if slab_bytes <= single_shot_max_bytes:
        return _w_loss_single_shot(scalars, w_flat, labels_flat, N, P0, itemsize)
    return _w_loss_gridded(scalars, w_flat, labels_flat, N, P0, itemsize)


if __name__ == "__main__":
    import numpy as np

    key = jax.random.PRNGKey(0)
    k1, k2, k3, k4, k5, k6 = jax.random.split(key, 6)
    loss = jnp.float32(1.5)
    weight = 0.001

    def _ref(w_np, l_np):
        return float(loss) + weight * np.abs(
            np.asarray(l_np, np.float64)[None] - np.asarray(w_np, np.float64)
        ).sum()

    # --- Test 1: small list input -> single-shot path (module's typical use).
    N, R, C = 3, 8, 32
    w_all = [jax.random.normal(k, (R, C), jnp.float32)
             for k in jax.random.split(k1, N)]
    labels_w = jax.random.normal(k2, (R, C), jnp.float32)
    res1 = w_loss_forward(w_all, labels_w, loss, weight=weight)
    jax.block_until_ready(res1)
    ref1 = _ref(np.stack([np.asarray(w) for w in w_all]), labels_w)
    assert np.allclose(float(res1), ref1, rtol=1e-3, atol=1e-3), (float(res1), ref1)

    # --- Test 2: gridded path, multiple row chunks + masked row tail.
    N2, R2, C2 = 250, 16, 72                      # P0 = 1152 (9 * 128)
    w2 = jax.random.normal(k3, (N2, R2, C2), jnp.float32)
    lab2 = jax.random.normal(k4, (R2, C2), jnp.float32)
    res2 = w_loss_forward(w2, lab2, loss, weight=weight, single_shot_max_bytes=0)
    jax.block_until_ready(res2)
    ref2 = _ref(w2, lab2)
    assert np.allclose(float(res2), ref2, rtol=1e-3, atol=1e-3), (float(res2), ref2)

    # --- Test 3: gridded path, multiple column chunks + zero column padding.
    N3, R3, C3 = 24, 46, 100                      # P0 = 4600 -> bP = 512
    w3 = jax.random.normal(k5, (N3, R3, C3), jnp.float32)
    lab3 = jax.random.normal(k6, (R3, C3), jnp.float32)
    res3 = w_loss_forward(w3, lab3, loss, weight=weight, single_shot_max_bytes=0)
    jax.block_until_ready(res3)
    ref3 = _ref(w3, lab3)
    assert np.allclose(float(res3), ref3, rtol=1e-3, atol=1e-3), (float(res3), ref3)

    print("KERNEL_OK")
</pallas_src>

<mosaic_0001>
module attributes {stable_mosaic.version = 11 : i64} {
  func.func @_w_loss_single_kernel(%arg0: memref<2xf32, #tpu.memory_space<smem>>, %arg1: memref<3x256xf32, #tpu.memory_space<vmem>>, %arg2: memref<1x256xf32, #tpu.memory_space<vmem>>, %arg3: memref<1xf32, #tpu.memory_space<smem>>) attributes {dimension_semantics = [], scalar_prefetch = 0 : i64, scratch_operands = 0 : i64, tpu.core_type = #tpu.core_type<tc>} {
    %c0 = arith.constant 0 : index
    %c0_0 = arith.constant 0 : index
    %0 = vector.load %arg2[%c0, %c0_0] : memref<1x256xf32, #tpu.memory_space<vmem>>, vector<1x256xf32>
    %c0_1 = arith.constant 0 : index
    %c0_2 = arith.constant 0 : index
    %1 = vector.load %arg1[%c0_1, %c0_2] : memref<3x256xf32, #tpu.memory_space<vmem>>, vector<3x256xf32>
    %2 = vector.broadcast %0 : vector<1x256xf32> to vector<3x256xf32>
    %3 = arith.subf %2, %1 : vector<3x256xf32>
    %4 = math.absf %3 : vector<3x256xf32>
    %5 = vector.shape_cast %4 : vector<3x256xf32> to vector<1x3x256xf32>
    %cst = arith.constant dense<0.000000e+00> : vector<1xf32>
    %6 = vector.multi_reduction <add>, %5, %cst [1, 2] : vector<1x3x256xf32> to vector<1xf32>
    %7 = vector.shape_cast %6 : vector<1xf32> to vector<1x1x1xf32>
    %8 = vector.extract %7[0, 0, 0] : f32 from vector<1x1x1xf32>
    %c0_3 = arith.constant 0 : index
    %9 = memref.load %arg0[%c0_3] : memref<2xf32, #tpu.memory_space<smem>>
    %c1 = arith.constant 1 : index
    %10 = memref.load %arg0[%c1] : memref<2xf32, #tpu.memory_space<smem>>
    %11 = arith.mulf %10, %8 : f32
    %12 = arith.addf %9, %11 : f32
    %c0_4 = arith.constant 0 : index
    %13 = memref.load %arg3[%c0_4] : memref<1xf32, #tpu.memory_space<smem>>
    memref.store %12, %arg3[%c0_4] : memref<1xf32, #tpu.memory_space<smem>>
    return
  }
}

</mosaic_0001>

<bundles_post_ra>
// kernel: tpu_custom_call.1
= control target key start
LH: loop header
LB: loop body
LE: loop exit
PB: predicated region body
PF: predicated region fallthrough
CT: control target
= control target key end

     0   :  { %8 = vsyncpa [#allocation4], 0  ;;  %s209_s0 = inlined_call_operand.hbm [shape: f32[2], index: 0, kind: input, shape index: {}]   ;;  %s210_s1 = inlined_call_operand.hbm [shape: f32[3,256], index: 1, kind: input, shape index: {}]   ;;  %s211_s2 = inlined_call_operand.vmem [shape: f32[1,256], index: 2, kind: input, shape index: {}]   ;;  %s212_s3 = inlined_call_operand.hbm [shape: f32[1], index: 3, kind: output, shape index: {}]  }
   0x1   :  { %9 = vsyncpa [#allocation3], 0 }
   0x2   :  { %10 = vsyncpa [#allocation5], 0  ;;  %s99_s14 = scalar_lea.hbm %s209_s0, 16 }
   0x3   :  { %p100_p0 = scmp.ne.s32.totalorder %s209_s0, %s99_s14  ;;  %p103_p1 = scmp.lt.u32.totalorder %s99_s14, %s209_s0 }
   0x5   :  { %p105_p2 = pnand %p103_p1, %p100_p0 }
   0x7   :  { %108 = shalt.err (!%p105_p2)
}
   0x8   :  { %s147_s19 = smov [#allocation2]   ;;  %s148_s22 = smov [#allocation6]  }
   0x9   :  { %18 = dma.hbm_to_smem %s209_s0, 16, %s147_s19, [#allocation4]  }
   0xa   :  { %s25_s23 = sshll.u32 %s148_s22, 4  ;;  %s109_s26 = scalar_lea.hbm %s210_s1, 128  ;;  %s26_s23 = int_to_ptr.vmem [resolvable:$true] %s25_s23 }
   0xb   :  { %p110_p3 = scmp.ne.s32.totalorder %s210_s1, %s109_s26  ;;  %p113_p4 = scmp.lt.u32.totalorder %s109_s26, %s210_s1 }
   0xd   :  { %p115_p5 = pnand %p113_p4, %p110_p3 }
   0xf   :  { %118 = shalt.err (!%p115_p5)
}
  0x10   :  { %s119_s4 = scalar_lea.vmem %s26_s23, 128  ;;  %p124_p7 = scmp.lt.s32.totalorder %s26_s23, %s26_s23 }
  0x11   :  { %p120_p6 = scmp.ne.s32.totalorder %s26_s23, %s119_s4  ;;  %p125_p8 = scmp.lt.s32.totalorder %s119_s4, %s119_s4 }
  0x13   :  { %p126_p9 = por %p125_p8, %p124_p7 }
  0x15   :  { %p127_p10 = pnand %p126_p9, %p120_p6 }
  0x17   :  { %130 = shalt.err (!%p127_p10)
}
  0x18   :  { %28 = dma.hbm_to_vmem [thread:$0]  %s210_s1, 128, %s26_s23, [#allocation3]  }
  0x19   :  { %141 = dma.done.wait [#allocation4], 16  }
  0x1a   :  { %142 = vsyncadd [#allocation4], 4294967280 }
  0x1b   :  { %143 = dma.done.wait [#allocation3], 128  }
  0x1c   :  { %144 = vsyncadd [#allocation3], 4294967168 }
  0x1d   :  { %37 = sfence }
  0x1e   :  { %v41_v0 = vlaneseq  ;;  %v39_v1 = vld [vmem:[#allocation6] sm:$0x77]  ;;  %v38_v3 = vld [vmem:[%s211_s2] sm:$0x3]  ;;  %vm58_vm0 = vcmask 1042432   ;;  %s92_s1 = sld [smem:[#allocation2 + $0x1]] }
  0x1f   :  { %v52_v6 = vcombine.high %v39_v1, %v39_v1  ;;  %s71_s2 = sld [smem:[#allocation2]]  ;;  %s131_s13 = scalar_lea.hbm %s212_s3, 16 }
  0x20   :  { %v42_v2 = vshrl.u32 %v41_v0, 7  ;;  %p132_p11 = scmp.ne.s32.totalorder %s212_s3, %s131_s13  ;;  %p135_p12 = scmp.lt.u32.totalorder %s131_s13, %s212_s3 }
  0x22   :  { %v43_v4 = vsub.s32 0, %v42_v2  ;;  %v47_v5 = vsub.s32 1, %v42_v2  ;;  %p137_p13 = pnand %p135_p12, %p132_p11 }
  0x24   :  { %v44_v7 = vrot.slane %v38_v3, %v43_v4  ;;  %v48_v8 = vrot.slane %v38_v3, %v47_v5 }
  0x26   :  { %v54_v9 = vsub.f32 %v44_v7, %v39_v1  ;;  %v55_v10 = vsub.f32 %v48_v8, %v52_v6 }
  0x28   :  { %v56_v11 = vand.u32 2147483647, %v54_v9  ;;  %v57_v12 = vand.u32 2147483647, %v55_v10 }
  0x2a   :  { %v59_v13 = vsel %vm58_vm0, %v56_v11, 0.0  ;;  %v60_v14 = vsel %vm58_vm0, %v57_v12, 0.0 }
  0x2b   :  { %v61_v15 = vadd.f32 %v60_v14, %v59_v13 }
  0x2d   :  { %62 = vadd.xlane.f32.xlu0 %v61_v15 }
  0xba   :  { %v63_v16 = vpop.xlane.xlu0 %62 }
  0xbb   :  { %v64_v17 = vrot.slane %v63_v16, 4 }
  0xbd   :  { %v65_v18 = vadd.f32 %v64_v17, %v63_v16 }
  0xbf   :  { %v66_v19 = vrot.slane %v65_v18, 2 }
  0xc1   :  { %v67_v20 = vadd.f32 %v66_v19, %v65_v18 }
  0xc3   :  { %v68_v21 = vrot.slane %v67_v20, 1 }
  0xc5   :  { %v69_v22 = vadd.f32 %v68_v21, %v67_v20 }
  0xc7   :  { %93 = vpush %v69_v22 }
  0xf8   :  { %s94_s8 = spop %93 }
  0xf9   :  { %s73_s9 = smul.f32 %s94_s8, %s92_s1 }
  0xfb   :  { %s74_s10 = sadd.f32 %s73_s9, %s71_s2 }
  0xfd   :  { %76 = sst [smem:[#allocation7]] %s74_s10 }
  0xfe   :  { %140 = shalt.err (!%p137_p13)
}
  0xff   :  { %s149_s18 = smov [#allocation7]  }
 0x100   :  { %84 = dma.smem_to_hbm %s149_s18, 16, %s212_s3, [#allocation5]  }
 0x101   :  { %145 = dma.done.wait [#allocation5], 16  }
 0x102   :  { %146 = vsyncadd [#allocation5], 4294967280 }
 0x103   :  { %88 = sfence }
 0x104   :  { %89 = vsyncpa [#allocation3], 1 }
 0x105   :  { %90 = vsyncpa [#allocation4], 1 }
 0x106   :  { %91 = vsyncpa [#allocation5], 1 }

</bundles_post_ra>
